<compile_context>
chip_gen: v7x
topology: tpu7x:2x2x1
jax: 0.10.0
libtpu: 0.0.40
codegen_flags: <defaults>
</compile_context>

<pallas_src>
import math
import functools
from itertools import combinations
from types import SimpleNamespace

import numpy as np
import jax
import jax.numpy as jnp
from jax.experimental import pallas as pl
from jax.experimental.pallas import tpu as pltpu


def _round_up(v, m):
    return (v + m - 1) // m * m


# ---------------------------------------------------------------------------
# Pallas kernel 1: fused K/V projection head  (x @ [wk||wv] + b, LayerNorm(K))
# Row-tiled over the flattened (num_clips * num_tuples) axis; weights resident.
# ---------------------------------------------------------------------------
def _proj_kernel(x_ref, w_ref, b_ref, g_ref, be_ref, k_ref, v_ref,
                 *, out_dim, ln_eps):
    # x_ref: (tm, F) bf16 ; w_ref: (F, 2*O) bf16 ; b_ref: (1, 2*O) f32
    # g_ref/be_ref: (1, O) f32 LayerNorm affine ; outputs: (tm, O) bf16.
    kv = jnp.dot(x_ref[...], w_ref[...],
                 preferred_element_type=jnp.float32) + b_ref[...]
    # For realistic TRX sizes out_dim is a multiple of 128 so this split is
    # lane-tile aligned; for the toy O=32 it is a cheap in-tile slice.
    k = kv[:, :out_dim]
    v = kv[:, out_dim:]

    # torch.nn.LayerNorm semantics: biased variance, eps=1e-5, affine (f32).
    mu = jnp.mean(k, axis=-1, keepdims=True)
    var = jnp.mean((k - mu) ** 2, axis=-1, keepdims=True)
    kn = (k - mu) * jax.lax.rsqrt(var + ln_eps) * g_ref[...] + be_ref[...]

    k_ref[...] = kn.astype(k_ref.dtype)
    v_ref[...] = v.astype(v_ref.dtype)


def project_kv(x, w_kv, b_kv, gamma_k, beta_k, out_dim, *,
               block_rows=512, ln_eps=1e-5):
    """x: (M, F) bf16 flattened rows. Returns (ks, vs), each (M, out_dim) bf16."""
    M, F = x.shape
    O2 = w_kv.shape[1]
    tm = min(block_rows, _round_up(M, 8))
    m_pad = _round_up(M, tm)
    if m_pad != M:
        x = jnp.pad(x, ((0, m_pad - M), (0, 0)))
    grid_rows = m_pad // tm

    # Explicit VMEM budget: double-buffered row tiles + resident bf16 weights.
    bytes_per_step = (tm * F * 2                    # x tile (bf16)
                      + F * O2 * 2                  # fused weights (bf16)
                      + (O2 + 2 * out_dim) * 4      # biases + LN affine (f32)
                      + 2 * tm * out_dim * 2)       # two bf16 output tiles
    vmem_limit = min(max(2 * bytes_per_step + (2 << 20), 16 << 20), 100 << 20)

    kernel = functools.partial(_proj_kernel, out_dim=out_dim, ln_eps=ln_eps)
    ks, vs = pl.pallas_call(
        kernel,
        out_shape=(jax.ShapeDtypeStruct((m_pad, out_dim), jnp.bfloat16),
                   jax.ShapeDtypeStruct((m_pad, out_dim), jnp.bfloat16)),
        grid=(grid_rows,),
        in_specs=[
            pl.BlockSpec((tm, F), lambda i: (i, 0)),
            pl.BlockSpec((F, O2), lambda i: (0, 0)),
            pl.BlockSpec((1, O2), lambda i: (0, 0)),
            pl.BlockSpec((1, out_dim), lambda i: (0, 0)),
            pl.BlockSpec((1, out_dim), lambda i: (0, 0)),
        ],
        out_specs=(pl.BlockSpec((tm, out_dim), lambda i: (i, 0)),
                   pl.BlockSpec((tm, out_dim), lambda i: (i, 0))),
        compiler_params=pltpu.CompilerParams(
            dimension_semantics=("parallel",),
            vmem_limit_bytes=int(vmem_limit)),
    )(x, w_kv, b_kv, gamma_k, beta_k)
    return ks[:M], vs[:M]


# ---------------------------------------------------------------------------
# Pallas kernel 2: per-class cross attention + distance logits
# grid axis = class; each step writes its own disjoint (1, n_q, 1) block.
# ---------------------------------------------------------------------------
def _attn_kernel(qk_ref, qv_ref, ck_ref, cv_ref, scale_ref, out_ref,
                 *, inv_sqrt_d):
    # qk/qv: (n_q*T, O) bf16 ; ck/cv: (1, shot*T, O) bf16 ; out: (1, n_q, 1) f32
    n_q = out_ref.shape[1]
    rows, feat = qk_ref.shape
    T = rows // n_q

    qk = qk_ref[...]
    ck = ck_ref[0]
    # scores[q*T+i, s*T+j] = <qk, ck> / sqrt(O); bf16 MXU, f32 accumulate.
    # Contract on the last dim of both operands (no materialized ck.T).
    scores = jax.lax.dot_general(
        qk, ck, (((1,), (1,)), ((), ())),
        preferred_element_type=jnp.float32) * inv_sqrt_d

    # softmax jointly over all support tuples of this class (f32, EUP recip)
    m = jnp.max(scores, axis=-1, keepdims=True)
    e = jnp.exp(scores - m)
    attn = e * pl.reciprocal(jnp.sum(e, axis=-1, keepdims=True), approx=True)

    # query prototype (sum over support clips folded into the flattened matmul)
    proto = jnp.dot(attn.astype(cv_ref.dtype), cv_ref[0],
                    preferred_element_type=jnp.float32)       # (n_q*T, O) f32

    diff = qv_ref[...].astype(jnp.float32) - proto
    sq = (diff * diff).reshape(n_q, T, feat)
    norm_sq = jnp.sum(jnp.sum(sq, axis=2), axis=1, keepdims=True)   # (n_q, 1)

    dist = -(norm_sq * scale_ref[0])       # scale = gt * tw / tuples_len
    out_ref[...] = dist.reshape(out_ref.shape)


def class_attention(q_ks, q_vs, class_ks, class_vs, scale, n_q):
    """Returns per-class distances of shape (n_classes, n_q)."""
    rows, O = q_ks.shape
    n_cls, sT, _ = class_ks.shape
    kernel = functools.partial(_attn_kernel, inv_sqrt_d=1.0 / math.sqrt(O))
    out = pl.pallas_call(
        kernel,
        out_shape=jax.ShapeDtypeStruct((n_cls, n_q, 1), jnp.float32),
        grid=(n_cls,),
        in_specs=[
            pl.BlockSpec((rows, O), lambda c: (0, 0)),
            pl.BlockSpec((rows, O), lambda c: (0, 0)),
            pl.BlockSpec((1, sT, O), lambda c: (c, 0, 0)),
            pl.BlockSpec((1, sT, O), lambda c: (c, 0, 0)),
            pl.BlockSpec(memory_space=pltpu.MemorySpace.SMEM),
        ],
        out_specs=pl.BlockSpec((1, n_q, 1), lambda c: (c, 0, 0)),
        compiler_params=pltpu.CompilerParams(
            dimension_semantics=("parallel",)),   # safe: disjoint output blocks
    )(q_ks, q_vs, class_ks, class_vs, scale)
    return out[:, :, 0]                            # (n_cls, n_q)


# ---------------------------------------------------------------------------
# Glue: positional encoding, tuple construction, parameters, forward
# ---------------------------------------------------------------------------
def positional_encoding_table(seq_len, d_model, scale=0.1):
    # TRX PositionalEncoding with pe_scale_factor=0.1 (dropout identity in eval).
    max_len = int(seq_len * 1.5)
    pos = np.arange(max_len, dtype=np.float32)[:, None]
    div = np.exp(np.arange(0, d_model, 2, dtype=np.float32)
                 * (-math.log(10000.0) / d_model))
    pe = np.zeros((max_len, d_model), np.float32)
    pe[:, 0::2] = np.sin(pos * div) * scale
    pe[:, 1::2] = np.cos(pos * div) * scale
    return jnp.asarray(pe[:seq_len])


def make_params(args, temporal_set_size, key):
    D = args.backbone_feature_dimension
    F = D * temporal_set_size
    O = args.trans_linear_out_dim
    k1, k2, k3, k4 = jax.random.split(key, 4)
    return {
        "wk": jax.random.normal(k1, (F, O), jnp.float32) * 0.05,
        "bk": jax.random.normal(k2, (1, O), jnp.float32) * 0.01,
        "wv": jax.random.normal(k3, (F, O), jnp.float32) * 0.05,
        "bv": jax.random.normal(k4, (1, O), jnp.float32) * 0.01,
        "gk": jnp.ones((1, O), jnp.float32),      # LayerNorm gamma
        "bek": jnp.zeros((1, O), jnp.float32),    # LayerNorm beta
        "gt": float(args.matching_global_temperature),
        "tw": float(args.matching_temperature_weight),
    }


def trx_forward(params, args, temporal_set_size, support_set, support_labels,
                queries, *, block_rows=512):
    D = args.backbone_feature_dimension
    pe = positional_encoding_table(args.seq_len, D)

    support_set = support_set + pe[None, :, :]
    queries = queries + pe[None, :, :]

    tuples_idx = jnp.asarray(
        np.array(list(combinations(range(args.seq_len), temporal_set_size)),
                 dtype=np.int32))
    T = tuples_idx.shape[0]
    n_s, n_q = support_set.shape[0], queries.shape[0]

    # Wrapper-side flattening: kernels only see (rows, features) slabs.
    s_t = support_set[:, tuples_idx, :].reshape(n_s * T, -1)
    q_t = queries[:, tuples_idx, :].reshape(n_q * T, -1)
    x = jnp.concatenate([s_t, q_t], axis=0).astype(jnp.bfloat16)   # (M, F)

    O = params["wk"].shape[1]
    w_kv = jnp.concatenate([params["wk"], params["wv"]], axis=1).astype(jnp.bfloat16)
    b_kv = jnp.concatenate([params["bk"], params["bv"]], axis=1)   # f32

    ks, vs = project_kv(x, w_kv, b_kv, params["gk"], params["bek"], O,
                        block_rows=block_rows)                      # (M, O) bf16
    s_ks, s_vs = ks[:n_s * T], vs[:n_s * T]
    q_ks, q_vs = ks[n_s * T:], vs[n_s * T:]

    # Per-class support selection (host-side glue; equal shots per class).
    labels_np = np.asarray(support_labels)
    uniq = np.unique(labels_np)
    class_idx = np.stack([np.where(labels_np == c)[0] for c in uniq])  # (n_cls, shot)
    n_cls, shot = class_idx.shape
    row_idx = (class_idx[:, :, None] * T
               + np.arange(T, dtype=np.int32)[None, None, :]).reshape(-1)
    gather = jnp.asarray(row_idx, dtype=jnp.int32)
    class_ks = jnp.take(s_ks, gather, axis=0).reshape(n_cls, shot * T, O)
    class_vs = jnp.take(s_vs, gather, axis=0).reshape(n_cls, shot * T, O)

    scale = jnp.asarray([params["gt"] * params["tw"] / T], jnp.float32)
    per_class = class_attention(q_ks, q_vs, class_ks, class_vs, scale, n_q)

    logits = jnp.zeros((n_q, args.way), jnp.float32)
    logits = logits.at[:, jnp.asarray(uniq, dtype=jnp.int32)].set(per_class.T)
    return {"logits": logits}


# ---------------------------------------------------------------------------
# Pure-JAX reference mirroring the kernels' bf16 matmul precision
# (f32 accumulation, f32 LayerNorm/softmax/distance), used for verification.
# ---------------------------------------------------------------------------
def trx_reference(params, args, temporal_set_size, support_set, support_labels,
                  queries):
    D = args.backbone_feature_dimension
    pe = positional_encoding_table(args.seq_len, D)
    s = support_set + pe[None]
    q = queries + pe[None]
    tuples_idx = np.array(list(combinations(range(args.seq_len), temporal_set_size)),
                          dtype=np.int32)
    T = tuples_idx.shape[0]
    n_s, n_q = s.shape[0], q.shape[0]
    s_t = s[:, tuples_idx, :].reshape(n_s, T, -1)
    q_t = q[:, tuples_idx, :].reshape(n_q, T, -1)
    O = params["wk"].shape[1]

    def proj(x):
        xb = x.astype(jnp.bfloat16)
        k = jnp.dot(xb, params["wk"].astype(jnp.bfloat16),
                    preferred_element_type=jnp.float32) + params["bk"]
        v = jnp.dot(xb, params["wv"].astype(jnp.bfloat16),
                    preferred_element_type=jnp.float32) + params["bv"]
        mu = k.mean(-1, keepdims=True)
        var = ((k - mu) ** 2).mean(-1, keepdims=True)
        kn = (k - mu) / jnp.sqrt(var + 1e-5) * params["gk"] + params["bek"]
        return kn.astype(jnp.bfloat16), v.astype(jnp.bfloat16)

    s_ks, s_vs = proj(s_t)
    q_ks, q_vs = proj(q_t)
    qk_flat = q_ks.reshape(n_q * T, O)
    qv_flat = q_vs.reshape(n_q * T, O).astype(jnp.float32)

    labels_np = np.asarray(support_labels)
    logits = np.zeros((n_q, args.way), dtype=np.float32)
    for c in np.unique(labels_np):
        idx = np.where(labels_np == c)[0]
        ck = s_ks[idx].reshape(-1, O)
        cv = s_vs[idx].reshape(-1, O)
        scores = jnp.dot(qk_flat, ck.T,
                         preferred_element_type=jnp.float32) / math.sqrt(O)
        attn = jax.nn.softmax(scores, axis=-1)
        proto = jnp.dot(attn.astype(jnp.bfloat16), cv,
                        preferred_element_type=jnp.float32)
        diff = qv_flat - proto
        norm_sq = jnp.sum((diff * diff).reshape(n_q, T * O), axis=-1)
        dist = -norm_sq / T * params["gt"] * params["tw"]
        logits[:, int(c)] = np.asarray(dist)
    return logits


# ---------------------------------------------------------------------------
if __name__ == "__main__":
    args = SimpleNamespace(
        seq_len=8,
        backbone_feature_dimension=32,
        trans_linear_out_dim=32,
        trans_dropout=0.1,
        way=2,
        matching_global_temperature=10.0,
        matching_global_temperature_fixed=True,
        matching_temperature_weight=0.5,
        matching_temperature_weight_fixed=True,
    )
    temporal_set_size = 2          # pairs -> C(8, 2) = 28 tuples
    shot = 2
    n_support = args.way * shot    # 4
    n_queries = 3

    key = jax.random.PRNGKey(0)
    kp, ks_, kq = jax.random.split(key, 3)
    params = make_params(args, temporal_set_size, kp)

    support_set = jax.random.normal(
        ks_, (n_support, args.seq_len, args.backbone_feature_dimension), jnp.float32)
    queries = jax.random.normal(
        kq, (n_queries, args.seq_len, args.backbone_feature_dimension), jnp.float32)
    support_labels = np.array([0, 0, 1, 1], dtype=np.int32)

    # block_rows=128 so the toy episode exercises a multi-step (pipelined)
    # projection grid; use the 256-512 default for realistic episode sizes.
    out = trx_forward(params, args, temporal_set_size,
                      support_set, support_labels, queries, block_rows=128)
    logits = jax.block_until_ready(out["logits"])

    ref = trx_reference(params, args, temporal_set_size,
                        support_set, support_labels, queries)

    assert logits.shape == (n_queries, args.way)
    # bf16 matmuls + EUP approx reciprocal => compare against the precision-
    # matched reference with a correspondingly relaxed tolerance.
    assert np.allclose(np.asarray(logits), ref, rtol=1e-2, atol=1e-2), (
        f"mismatch:\n{np.asarray(logits)}\nvs\n{ref}")
    print("KERNEL_OK")
</pallas_src>

<mosaic_0001>
module attributes {stable_mosaic.version = 11 : i64} {
  func.func @_proj_kernel(%arg0: i32, %arg1: memref<128x64xbf16, #tpu.memory_space<vmem>>, %arg2: memref<64x64xbf16, #tpu.memory_space<vmem>>, %arg3: memref<1x64xf32, #tpu.memory_space<vmem>>, %arg4: memref<1x32xf32, #tpu.memory_space<vmem>>, %arg5: memref<1x32xf32, #tpu.memory_space<vmem>>, %arg6: memref<128x32xbf16, #tpu.memory_space<vmem>>, %arg7: memref<128x32xbf16, #tpu.memory_space<vmem>>) attributes {dimension_semantics = [#tpu.dimension_semantics<parallel>], iteration_bounds = array<i64: 2>, scalar_prefetch = 0 : i64, scratch_operands = 0 : i64, tpu.core_type = #tpu.core_type<tc>, window_params = [{transform_indices = @transform_0, window_bounds = array<i64: 128, 64>}, {pipeline_mode = #tpu.pipeline_mode<synchronous>, transform_indices = @transform_1, window_bounds = array<i64: 64, 64>}, {pipeline_mode = #tpu.pipeline_mode<synchronous>, transform_indices = @transform_2, window_bounds = array<i64: 1, 64>}, {pipeline_mode = #tpu.pipeline_mode<synchronous>, transform_indices = @transform_3, window_bounds = array<i64: 1, 32>}, {pipeline_mode = #tpu.pipeline_mode<synchronous>, transform_indices = @transform_4, window_bounds = array<i64: 1, 32>}, {transform_indices = @transform_5, window_bounds = array<i64: 128, 32>}, {transform_indices = @transform_6, window_bounds = array<i64: 128, 32>}]} {
    %c0 = arith.constant 0 : index
    %c0_0 = arith.constant 0 : index
    %0 = vector.load %arg1[%c0, %c0_0] : memref<128x64xbf16, #tpu.memory_space<vmem>>, vector<128x64xbf16>
    %c0_1 = arith.constant 0 : index
    %c0_2 = arith.constant 0 : index
    %1 = vector.load %arg2[%c0_1, %c0_2] : memref<64x64xbf16, #tpu.memory_space<vmem>>, vector<64x64xbf16>
    %cst = arith.constant dense<0.000000e+00> : vector<128x64xf32>
    %2 = tpu.matmul %0, %1, %cst {dimension_numbers = #tpu.dot_dimension_numbers<[1], [0], [0], [1], [0, 0, 1, 1], [], []>} : vector<128x64xbf16>, vector<64x64xbf16>, vector<128x64xf32> -> vector<128x64xf32>
    %c0_3 = arith.constant 0 : index
    %c0_4 = arith.constant 0 : index
    %3 = vector.load %arg3[%c0_3, %c0_4] : memref<1x64xf32, #tpu.memory_space<vmem>>, vector<1x64xf32>
    %4 = vector.broadcast %3 : vector<1x64xf32> to vector<128x64xf32>
    %5 = arith.addf %2, %4 : vector<128x64xf32>
    %6 = vector.extract_strided_slice %5 {offsets = [0, 0], sizes = [128, 32], strides = [1, 1]} : vector<128x64xf32> to vector<128x32xf32>
    %7 = vector.extract_strided_slice %5 {offsets = [0, 32], sizes = [128, 32], strides = [1, 1]} : vector<128x64xf32> to vector<128x32xf32>
    %cst_5 = arith.constant dense<0.000000e+00> : vector<128xf32>
    %8 = vector.multi_reduction <add>, %6, %cst_5 [1] : vector<128x32xf32> to vector<128xf32>
    %9 = vector.shape_cast %8 : vector<128xf32> to vector<128x1xf32>
    %cst_6 = arith.constant 3.200000e+01 : f32
    %10 = vector.broadcast %cst_6 : f32 to vector<128x1xf32>
    %11 = arith.divf %9, %10 : vector<128x1xf32>
    %12 = vector.broadcast %11 : vector<128x1xf32> to vector<128x32xf32>
    %13 = arith.subf %6, %12 : vector<128x32xf32>
    %14 = arith.mulf %13, %13 : vector<128x32xf32>
    %cst_7 = arith.constant dense<0.000000e+00> : vector<128xf32>
    %15 = vector.multi_reduction <add>, %14, %cst_7 [1] : vector<128x32xf32> to vector<128xf32>
    %16 = vector.shape_cast %15 : vector<128xf32> to vector<128x1xf32>
    %cst_8 = arith.constant 3.200000e+01 : f32
    %17 = vector.broadcast %cst_8 : f32 to vector<128x1xf32>
    %18 = arith.divf %16, %17 : vector<128x1xf32>
    %19 = vector.broadcast %11 : vector<128x1xf32> to vector<128x32xf32>
    %20 = arith.subf %6, %19 : vector<128x32xf32>
    %cst_9 = arith.constant 9.99999974E-6 : f32
    %21 = vector.broadcast %cst_9 : f32 to vector<128x1xf32>
    %22 = arith.addf %18, %21 : vector<128x1xf32>
    %23 = math.rsqrt %22 : vector<128x1xf32>
    %24 = vector.broadcast %23 : vector<128x1xf32> to vector<128x32xf32>
    %25 = arith.mulf %20, %24 : vector<128x32xf32>
    %c0_10 = arith.constant 0 : index
    %c0_11 = arith.constant 0 : index
    %26 = vector.load %arg4[%c0_10, %c0_11] : memref<1x32xf32, #tpu.memory_space<vmem>>, vector<1x32xf32>
    %27 = vector.broadcast %26 : vector<1x32xf32> to vector<128x32xf32>
    %28 = arith.mulf %25, %27 : vector<128x32xf32>
    %c0_12 = arith.constant 0 : index
    %c0_13 = arith.constant 0 : index
    %29 = vector.load %arg5[%c0_12, %c0_13] : memref<1x32xf32, #tpu.memory_space<vmem>>, vector<1x32xf32>
    %30 = vector.broadcast %29 : vector<1x32xf32> to vector<128x32xf32>
    %31 = arith.addf %28, %30 : vector<128x32xf32>
    %32 = arith.truncf %31 : vector<128x32xf32> to vector<128x32xbf16>
    %c0_14 = arith.constant 0 : index
    %c0_15 = arith.constant 0 : index
    %33 = vector.load %arg6[%c0_14, %c0_15] : memref<128x32xbf16, #tpu.memory_space<vmem>>, vector<128x32xbf16>
    tpu.vector_store %arg6[%c0_14, %c0_15], %32 {strides = array<i32>} : memref<128x32xbf16, #tpu.memory_space<vmem>>, vector<128x32xbf16>,
    %34 = arith.truncf %7 : vector<128x32xf32> to vector<128x32xbf16>
    %c0_16 = arith.constant 0 : index
    %c0_17 = arith.constant 0 : index
    %35 = vector.load %arg7[%c0_16, %c0_17] : memref<128x32xbf16, #tpu.memory_space<vmem>>, vector<128x32xbf16>
    tpu.vector_store %arg7[%c0_16, %c0_17], %34 {strides = array<i32>} : memref<128x32xbf16, #tpu.memory_space<vmem>>, vector<128x32xbf16>,
    return
  }
  func.func @transform_0(%arg0: i32) -> (i32, i32) {
    %c0_i32 = arith.constant 0 : i32
    %c0_i32_0 = arith.constant 0 : i32
    return %arg0, %c0_i32 : i32, i32
  }
  func.func @transform_1(%arg0: i32) -> (i32, i32) {
    %c0_i32 = arith.constant 0 : i32
    %c0_i32_0 = arith.constant 0 : i32
    %c0_i32_1 = arith.constant 0 : i32
    return %c0_i32, %c0_i32_0 : i32, i32
  }
  func.func @transform_2(%arg0: i32) -> (i32, i32) {
    %c0_i32 = arith.constant 0 : i32
    %c0_i32_0 = arith.constant 0 : i32
    %c0_i32_1 = arith.constant 0 : i32
    return %c0_i32, %c0_i32_0 : i32, i32
  }
  func.func @transform_3(%arg0: i32) -> (i32, i32) {
    %c0_i32 = arith.constant 0 : i32
    %c0_i32_0 = arith.constant 0 : i32
    %c0_i32_1 = arith.constant 0 : i32
    return %c0_i32, %c0_i32_0 : i32, i32
  }
  func.func @transform_4(%arg0: i32) -> (i32, i32) {
    %c0_i32 = arith.constant 0 : i32
    %c0_i32_0 = arith.constant 0 : i32
    %c0_i32_1 = arith.constant 0 : i32
    return %c0_i32, %c0_i32_0 : i32, i32
  }
  func.func @transform_5(%arg0: i32) -> (i32, i32) {
    %c0_i32 = arith.constant 0 : i32
    %c0_i32_0 = arith.constant 0 : i32
    return %arg0, %c0_i32 : i32, i32
  }
  func.func @transform_6(%arg0: i32) -> (i32, i32) {
    %c0_i32 = arith.constant 0 : i32
    %c0_i32_0 = arith.constant 0 : i32
    return %arg0, %c0_i32 : i32, i32
  }
}

</mosaic_0001>

<bundles_post_ra>
// kernel: tpu_custom_call.1
= control target key start
LH: loop header
LB: loop body
LE: loop exit
PB: predicated region body
PF: predicated region fallthrough
CT: control target
= control target key end

     0   :  { %s1267_s21 = smov 0   ;;  %s1649_s0 = inlined_call_operand.vmem [shape: bf16[256,64], index: 0, kind: input, shape index: {}]   ;;  %s1650_s1 = inlined_call_operand.vmem [shape: bf16[64,64], index: 1, kind: input, shape index: {}]   ;;  %s1651_s2 = inlined_call_operand.vmem [shape: f32[1,64], index: 2, kind: input, shape index: {}]   ;;  %s1652_s3 = inlined_call_operand.vmem [shape: f32[1,32], index: 3, kind: input, shape index: {}]   ;;  %s1653_s4 = inlined_call_operand.vmem [shape: f32[1,32], index: 4, kind: input, shape index: {}]   ;;  %s1654_s5 = inlined_call_operand.vmem [shape: bf16[256,32], index: 5, kind: output, shape index: {0}]   ;;  %s1655_s6 = inlined_call_operand.vmem [shape: bf16[256,32], index: 6, kind: output, shape index: {1}]  }
   0x1 LB: > { %s1026_s22 = sadd.s32 4294967295, %s1229_s21   ;;  %p1030_p0 = scmp.ge.s32.totalorder %s1229_s21, 1  ;;  %s1229_s21 = sphi %s1267_s21, %s17_s21  }
   0x2   : > { %p216_p1 = scmp.lt.s32.totalorder %s1229_s21, 3 }
   0x4   : > { %p217_p2 = pnand %p1030_p0, %p216_p1 }
   0x5   : > { %v1179_v0 = vld [vmem:[%s1650_s1] sm:$0xff] (!%p217_p2)   ;;  %s1031_s25 = sshll.u32 (!%p217_p2), %s1026_s22, 4  ;;  %v1180_v1 = vld [vmem:[%s1650_s1 + $0x8] sm:$0xff] (!%p217_p2)   ;;  %v1181_v2 = vld [vmem:[%s1650_s1 + $0x10] sm:$0xff] (!%p217_p2)   ;;  %vm365_vm0 = vcmask (!%p217_p2), 523264   ;;  %vm487_vm1 = vcmask (!%p217_p2), 261120  }
   0x6   : > { %220 = sbr.rel (%p217_p2) target bundleno = 686 (0x2ae), region = 40  ;;  %p252_p3 = scmp.lt.s32.totalorder (!%p217_p2), %s1031_s25, 31  ;;  %1138 = vmatprep.subr.bf16.mxu0 (!%p217_p2), %v1179_v0  ;;  %1162 = vmatprep.subr.bf16.mxu1 (!%p217_p2), %v1179_v0  ;;  %v1182_v3 = vld [vmem:[%s1650_s1 + $0x18] sm:$0xff] (!%p217_p2)   ;;  %v1037_v12 = vld [vmem:[%s1651_s2] ss:$0 sm:$0xff] (!%p217_p2)  ;;  %vm807_vm2 = vcmask (!%p217_p2), 257024  }
   0x7   : > { %1139 = vmatpush3.bf16.msra.mxu0 (!%p217_p2), %v1179_v0  ;;  %1166 = vmatpush3.bf16.msra.mxu1 (!%p217_p2), %v1179_v0  ;;  %s1231_s14 = smov (!%p217_p2), 96  }
   0x8   : > { %1140 = vmatprep.subr.bf16.mxu0 (!%p217_p2), %v1180_v1  ;;  %1163 = vmatprep.subr.bf16.mxu1 (!%p217_p2), %v1180_v1 }
   0xb   : > { %1141 = vmatpush3.bf16.msra.mxu0 (!%p217_p2), %v1180_v1  ;;  %1167 = vmatpush3.bf16.msra.mxu1 (!%p217_p2), %v1180_v1 }
   0xc   : > { %1142 = vmatprep.subr.bf16.mxu0 (!%p217_p2), %v1181_v2  ;;  %1164 = vmatprep.subr.bf16.mxu1 (!%p217_p2), %v1181_v2 }
   0xd   : > { %s1657_s25 = smov (!%p252_p3, %s1031_s25), 31 }
   0xe   : > { %s1284_s30 = sshll.u32 %s1657_s25, 2 }
   0xf   : > { %s255_s11 = scalar_lea.vmem %s1649_s0, %s1284_s30  ;;  %1143 = vmatpush3.bf16.msra.mxu0 %v1181_v2  ;;  %1168 = vmatpush3.bf16.msra.mxu1 %v1181_v2  ;;  %s1396_s17 = scalar_lea.vmem %s1655_s6, %s1284_s30 }
  0x10   : > { %v1183_v4 = vld [vmem:[%s255_s11] sm:$0xff]   ;;  %1144 = vmatprep.subr.bf16.mxu0 %v1182_v3  ;;  %1165 = vmatprep.subr.bf16.mxu1 %v1182_v3  ;;  %v1185_v6 = vld [vmem:[%s255_s11 + $0x8] sm:$0xff]   ;;  %v1187_v8 = vld [vmem:[%s255_s11 + $0x10] sm:$0xff]   ;;  %s1556_s25 = scalar_lea.vmem %s1654_s5, %s1284_s30 }
  0x11   : > { %v1184_v5 = vld [vmem:[%s255_s11 + $0x20] sm:$0xff]   ;;  %1146 = vmatprep.mubr.msk.bf16.mxu0 %vm365_vm0, %v1183_v4  ;;  %v1186_v7 = vld [vmem:[%s255_s11 + $0x28] sm:$0xff]   ;;  %v1189_v9 = vld [vmem:[%s255_s11 + $0x30] sm:$0xff]  }
  0x12   : > { %1154 = vmatprep.mubr.msk.bf16.mxu1 %vm365_vm0, %v1184_v5  ;;  %v1188_v10 = vld [vmem:[%s255_s11 + $0x18] sm:$0xff]  }
  0x13   : > { %1145 = vmatpush3.bf16.msra.mxu0 %v1182_v3  ;;  %1169 = vmatpush3.bf16.msra.mxu1 %v1182_v3  ;;  %v1190_v11 = vld [vmem:[%s255_s11 + $0x38] sm:$0xff]  }
  0x16   : > { %1147 = vmatmul.mubr.msk.bf16.vlgmr.msra.gmra.mrb[0].mxu0 %vm365_vm0, %v1185_v6  ;;  %1155 = vmatmul.mubr.msk.bf16.vlgmr.msra.gmra.mrb[0].mxu1 %vm365_vm0, %v1186_v7 }
  0x17   : > { %1150 = vmatprep.mubr.msk.bf16.mxu0 %vm365_vm0, %v1187_v8  ;;  %1158 = vmatprep.mubr.msk.bf16.mxu1 %vm365_vm0, %v1189_v9 }
  0x1e   : > { %1151 = vmatmul.mubr.msk.bf16.gmra.mrb[4].mxu0 %vm365_vm0, %v1188_v10  ;;  %1159 = vmatmul.mubr.msk.bf16.gmra.mrb[4].mxu1 %vm365_vm0, %v1190_v11 }
  0xe9   : > { %v1148_v13 = vpop.f32.mrb[0].mxu0  ;;  %v1156_v14 = vpop.f32.mrb[0].mxu1 }
  0xea   : > { %v1304_v15 = vadd.f32 %v1148_v13, %v1037_v12  ;;  %v1306_v16 = vadd.f32 %v1156_v14, %v1037_v12  ;;  %v424_v17 = vpop.f32.mrb[1].mxu0  ;;  %v456_v18 = vpop.f32.mrb[1].mxu1 }
  0xeb   : > { %v1149_v19 = vpop.f32.mrb[2].mxu0  ;;  %v1157_v20 = vpop.f32.mrb[2].mxu1  ;;  %v1308_v21 = vadd.f32 %v1037_v12, %v424_v17  ;;  %v1316_v27 = vadd.f32 %v1037_v12, %v456_v18 }
  0xec   : > { %v427_v22 = vpop.f32.mrb[3].mxu0  ;;  %v459_v23 = vpop.f32.mrb[3].mxu1  ;;  %v518_v24 = vsel %vm487_vm1, %v1306_v16, 0.0  ;;  %v494_v25 = vsel %vm487_vm1, %v1304_v15, 0.0  ;;  %v1112_v46 = vpack.c.bf16 %v1304_v15, %v1304_v15  ;;  %v1347_v49 = vadd.f32 %v1149_v19, %v1037_v12 }
  0xed   : > { %v1314_v26 = vadd.f32 %v1037_v12, %v427_v22  ;;  %519 = vadd.xlane.f32.xlu0 %v518_v24  ;;  %495 = vadd.xlane.f32.xlu1 %v494_v25  ;;  %v488_v28 = vsel %vm487_vm1, %v1308_v21, 0.0  ;;  %v512_v39 = vsel %vm487_vm1, %v1316_v27, 0.0  ;;  %v1110_v47 = vpack.c.bf16 %v1308_v21, %v1308_v21 }
  0xee   : > { %v1118_v48 = vpack.c.bf16 %v1316_v27, %v1316_v27  ;;  %v1349_v50 = vadd.f32 %v1157_v20, %v1037_v12  ;;  %v497_v51 = vsel %vm487_vm1, %v1347_v49, 0.0  ;;  %v1353_v52 = vadd.f32 %v1037_v12, %v459_v23 }
  0xef   : > { %v491_v55 = vsel %vm487_vm1, %v1314_v26, 0.0  ;;  %v1113_v59 = vpack.c.bf16 %v1347_v49, %v1347_v49  ;;  %v1111_v61 = vpack.c.bf16 %v1314_v26, %v1314_v26 }
  0xf0   : > { %v521_v53 = vsel %vm487_vm1, %v1349_v50, 0.0  ;;  %v515_v54 = vsel %vm487_vm1, %v1353_v52, 0.0  ;;  %v1119_v62 = vpack.c.bf16 %v1353_v52, %v1353_v52 }
  0xf1   : > { %489 = vadd.xlane.f32.xlu0 %v488_v28  ;;  %v1152_v29 = vpop.f32.mrb[4].mxu0  ;;  %v1160_v30 = vpop.f32.mrb[4].mxu1 }
  0xf2   : > { %v1320_v31 = vadd.f32 %v1152_v29, %v1037_v12  ;;  %v1322_v32 = vadd.f32 %v1160_v30, %v1037_v12  ;;  %v440_v33 = vpop.f32.mrb[5].mxu0  ;;  %v472_v34 = vpop.f32.mrb[5].mxu1 }
  0xf3   : > { %v1324_v35 = vadd.f32 %v1037_v12, %v440_v33  ;;  %v1326_v36 = vadd.f32 %v1037_v12, %v472_v34  ;;  %v1153_v37 = vpop.f32.mrb[6].mxu0  ;;  %v1161_v38 = vpop.f32.mrb[6].mxu1 }
  0xf4   : > { %v1330_v40 = vadd.f32 %v1153_v37, %v1037_v12  ;;  %v443_v41 = vpop.f32.mrb[7].mxu0  ;;  %v475_v42 = vpop.f32.mrb[7].mxu1  ;;  %v1334_v44 = vadd.f32 %v1161_v38, %v1037_v12  ;;  %v506_v56 = vsel %vm487_vm1, %v1320_v31, 0.0  ;;  %v530_v57 = vsel %vm487_vm1, %v1322_v32, 0.0 }
  0xf5   : > { %513 = vadd.xlane.f32.xlu0 %v512_v39  ;;  %v1332_v43 = vadd.f32 %v1037_v12, %v443_v41  ;;  %v1336_v45 = vadd.f32 %v1037_v12, %v475_v42  ;;  %v500_v58 = vsel %vm487_vm1, %v1324_v35, 0.0  ;;  %v524_v60 = vsel %vm487_vm1, %v1326_v36, 0.0 }
  0xf6   : > { %v1116_v63 = vpack.c.bf16 %v1320_v31, %v1320_v31  ;;  %v1114_v0 = vpack.c.bf16 %v1324_v35, %v1324_v35  ;;  %v509_v1 = vsel %vm487_vm1, %v1330_v40, 0.0  ;;  %v533_v2 = vsel %vm487_vm1, %v1334_v44, 0.0 }
  0xf7   : > { %v503_v3 = vsel %vm487_vm1, %v1332_v43, 0.0  ;;  %v527_v4 = vsel %vm487_vm1, %v1336_v45, 0.0  ;;  %v1117_v20 = vpack.c.bf16 %v1330_v40, %v1330_v40  ;;  %v1115_v28 = vpack.c.bf16 %v1332_v43, %v1332_v43 }
  0xfe   : > { %876 = vrot.lane.b32.xlu1 %v1112_v46, %s1231_s14 }
 0x10b   : > { %872 = vrot.lane.b32.xlu0 %v1110_v47, %s1231_s14 }
 0x10f   : > { %888 = vrot.lane.b32.xlu0 %v1118_v48, %s1231_s14 }
 0x122   : > { %498 = vadd.xlane.f32.xlu1 %v497_v51 }
 0x126   : > { %522 = vadd.xlane.f32.xlu1 %v521_v53 }
 0x12a   : > { %516 = vadd.xlane.f32.xlu1 %v515_v54 }
 0x12e   : > { %492 = vadd.xlane.f32.xlu0 %v491_v55 }
 0x132   : > { %507 = vadd.xlane.f32.xlu0 %v506_v56 }
 0x136   : > { %531 = vadd.xlane.f32.xlu0 %v530_v57 }
 0x13a   : > { %501 = vadd.xlane.f32.xlu0 %v500_v58 }
 0x13b   : > { %878 = vrot.lane.b32.xlu1 %v1113_v59, %s1231_s14 }
 0x13e   : > { %525 = vadd.xlane.f32.xlu0 %v524_v60 }
 0x13f   : > { %874 = vrot.lane.b32.xlu1 %v1111_v61, %s1231_s14 }
 0x143   : > { %890 = vrot.lane.b32.xlu1 %v1119_v62, %s1231_s14 }
 0x154   : > { %884 = vrot.lane.b32.xlu0 %v1116_v63, %s1231_s14 }
 0x158   : > { %880 = vrot.lane.b32.xlu0 %v1114_v0, %s1231_s14 }
 0x167   : > { %510 = vadd.xlane.f32.xlu1 %v509_v1 }
 0x16b   : > { %534 = vadd.xlane.f32.xlu1 %v533_v2 }
 0x16f   : > { %504 = vadd.xlane.f32.xlu1 %v503_v3 }
 0x173   : > { %528 = vadd.xlane.f32.xlu1 %v527_v4 }
 0x17a   : > { %v520_v5 = vpop.xlane.xlu0 %519  ;;  %v496_v6 = vpop.xlane.xlu1 %495 }
 0x17b   : > { %v547_v7 = vmul.f32 0.03125, %v520_v5  ;;  %v539_v8 = vmul.f32 0.03125, %v496_v6 }
 0x17d   : > { %v1399_v9 = vsub.f32 %v1306_v16, %v547_v7  ;;  %v1402_v10 = vsub.f32 %v1304_v15, %v539_v8 }
 0x17e   : > { %v877_v11 = vpop.permute.xlu1 %876  ;;  %v490_v12 = vpop.xlane.xlu0 %489 }
 0x17f   : > { %922 = vst.msk [vmem:[%s1396_s17 + $0x8] sm:$0xf] %vm807_vm2, %v877_v11  ;;  %v537_v13 = vmul.f32 0.03125, %v490_v12  ;;  %v571_v14 = vmul.f32 %v1402_v10, %v1402_v10  ;;  %v579_v19 = vmul.f32 %v1399_v9, %v1399_v9 }
 0x181   : > { %v1409_v17 = vsub.f32 %v1308_v21, %v537_v13  ;;  %v591_v18 = vsel %vm487_vm1, %v571_v14, 0.0  ;;  %v615_v21 = vsel %vm487_vm1, %v579_v19, 0.0 }
 0x182   : > { %592 = vadd.xlane.f32.xlu0 %v591_v18  ;;  %v514_v15 = vpop.xlane.xlu0 %513 }
 0x183   : > { %v545_v22 = vmul.f32 0.03125, %v514_v15  ;;  %v569_v24 = vmul.f32 %v1409_v17, %v1409_v17 }
 0x184   : > { %886 = vrot.lane.b32.xlu1 %v1117_v20, %s1231_s14 }
 0x185   : > { %v1418_v23 = vsub.f32 %v1316_v27, %v545_v22  ;;  %v585_v29 = vsel %vm487_vm1, %v569_v24, 0.0  ;;  %v1121_v24 = vpack.c.bf16 %v1349_v50, %v1349_v50 }
 0x186   : > { %616 = vadd.xlane.f32.xlu0 %v615_v21  ;;  %v873_v25 = vpop.permute.xlu0 %872 }
 0x187   : > { %920 = vst.msk [vmem:[%s1396_s17] sm:$0xf] %vm807_vm2, %v873_v25  ;;  %v577_v27 = vmul.f32 %v1418_v23, %v1418_v23  ;;  %v1120_v25 = vpack.c.bf16 %v1306_v16, %v1306_v16 }
 0x188   : > { %882 = vrot.lane.b32.xlu1 %v1115_v28, %s1231_s14  ;;  %v1122_v28 = vpack.c.bf16 %v1326_v36, %v1326_v36 }
 0x189   : > { %v609_v33 = vsel %vm487_vm1, %v577_v27, 0.0 }
 0x18a   : > { %586 = vadd.xlane.f32.xlu0 %v585_v29  ;;  %v889_v30 = vpop.permute.xlu0 %888  ;;  %v1124_v29 = vpack.c.bf16 %v1322_v32, %v1322_v32 }
 0x18b   : > { %928 = vst.msk [vmem:[%s1396_s17 + $0x20] sm:$0xf] %vm807_vm2, %v889_v30 }
 0x18e   : > { %610 = vadd.xlane.f32.xlu0 %v609_v33 }
 0x1af   : > { %v499_v34 = vpop.xlane.xlu1 %498 }
 0x1b0   : > { %v540_v37 = vmul.f32 0.03125, %v499_v34 }
 0x1b2   : > { %v1435_v38 = vsub.f32 %v1347_v49, %v540_v37 }
 0x1b3   : > { %v523_v39 = vpop.xlane.xlu1 %522 }
 0x1b4   : > { %v548_v41 = vmul.f32 0.03125, %v523_v39  ;;  %v572_v42 = vmul.f32 %v1435_v38, %v1435_v38 }
 0x1b6   : > { %v1440_v46 = vsub.f32 %v1349_v50, %v548_v41  ;;  %v594_v47 = vsel %vm487_vm1, %v572_v42, 0.0 }
 0x1b7   : > { %v517_v48 = vpop.xlane.xlu1 %516  ;;  %595 = vadd.xlane.f32.xlu1 %v594_v47 }
 0x1b8   : > { %v580_v51 = vmul.f32 %v1440_v46, %v1440_v46  ;;  %v546_v53 = vmul.f32 0.03125, %v517_v48 }
 0x1ba   : > { %v618_v49 = vsel %vm487_vm1, %v580_v51, 0.0  ;;  %v1449_v57 = vsub.f32 %v1353_v52, %v546_v53 }
 0x1bb   : > { %v879_v54 = vpop.permute.xlu1 %878  ;;  %619 = vadd.xlane.f32.xlu1 %v618_v49  ;;  %v493_v55 = vpop.xlane.xlu0 %492 }
 0x1bc   : > { %923 = vst.msk [vmem:[%s1396_s17 + $0xc] sm:$0xf] %vm807_vm2, %v879_v54  ;;  %v538_v56 = vmul.f32 0.03125, %v493_v55  ;;  %v578_v52 = vmul.f32 %v1449_v57, %v1449_v57 }
 0x1be   : > { %v1452_v58 = vsub.f32 %v1314_v26, %v538_v56 }
 0x1bf   : > { %v875_v59 = vpop.permute.xlu1 %874  ;;  %v508_v60 = vpop.xlane.xlu0 %507 }
 0x1c0   : > { %921 = vst.msk [vmem:[%s1396_s17 + $0x4] sm:$0xf] %vm807_vm2, %v875_v59  ;;  %v543_v61 = vmul.f32 0.03125, %v508_v60  ;;  %v570_v62 = vmul.f32 %v1452_v58, %v1452_v58 }
 0x1c2   : > { %v1459_v63 = vsub.f32 %v1320_v31, %v543_v61  ;;  %v588_v0 = vsel %vm487_vm1, %v570_v62, 0.0  ;;  %v612_v31 = vsel %vm487_vm1, %v578_v52, 0.0 }
 0x1c3   : > { %v891_v1 = vpop.permute.xlu1 %890  ;;  %589 = vadd.xlane.f32.xlu1 %v588_v0  ;;  %v532_v26 = vpop.xlane.xlu0 %531 }
 0x1c4   : > { %929 = vst.msk [vmem:[%s1396_s17 + $0x24] sm:$0xf] %vm807_vm2, %v891_v1  ;;  %v551_v2 = vmul.f32 0.03125, %v532_v26  ;;  %v575_v3 = vmul.f32 %v1459_v63, %v1459_v63  ;;  %v1123_v26 = vpack.c.bf16 %v1336_v45, %v1336_v45 }
 0x1c6   : > { %v1469_v4 = vsub.f32 %v1322_v32, %v551_v2  ;;  %v603_v5 = vsel %vm487_vm1, %v575_v3, 0.0 }
 0x1c7   : > { %613 = vadd.xlane.f32.xlu1 %v612_v31  ;;  %604 = vadd.xlane.f32.xlu0 %v603_v5  ;;  %v502_v6 = vpop.xlane.xlu0 %501  ;;  %v1125_v5 = vpack.c.bf16 %v1334_v44, %v1334_v44 }
 0x1c8   : > { %v541_v7 = vmul.f32 0.03125, %v502_v6  ;;  %v583_v8 = vmul.f32 %v1469_v4, %v1469_v4 }
 0x1ca   : > { %v1476_v11 = vsub.f32 %v1324_v35, %v541_v7  ;;  %v627_v12 = vsel %vm487_vm1, %v583_v8, 0.0  ;;  %v1541_v8 = vld [vmem:[%s1652_s3] ss:$0 sm:$0xff] }
 0x1cb   : > { %628 = vadd.xlane.f32.xlu0 %v627_v12  ;;  %v526_v13 = vpop.xlane.xlu0 %525 }
 0x1cc   : > { %v549_v14 = vmul.f32 0.03125, %v526_v13  ;;  %v573_v18 = vmul.f32 %v1476_v11, %v1476_v11  ;;  %v1547_v13 = vld [vmem:[%s1653_s4] ss:$0 sm:$0xff] }
 0x1ce   : > { %v1482_v19 = vsub.f32 %v1326_v36, %v549_v14  ;;  %v597_v15 = vsel %vm487_vm1, %v573_v18, 0.0 }
 0x1cf   : > { %598 = vadd.xlane.f32.xlu0 %v597_v15  ;;  %v885_v20 = vpop.permute.xlu0 %884 }
 0x1d0   : > { %v581_v22 = vmul.f32 %v1482_v19, %v1482_v19  ;;  %926 = vst.msk [vmem:[%s1396_s17 + $0x18] sm:$0xf] %vm807_vm2, %v885_v20 }
 0x1d2   : > { %v621_v35 = vsel %vm487_vm1, %v581_v22, 0.0 }
 0x1d3   : > { %622 = vadd.xlane.f32.xlu0 %v621_v35  ;;  %v881_v21 = vpop.permute.xlu0 %880 }
 0x1d4   : > { %924 = vst.msk [vmem:[%s1396_s17 + $0x10] sm:$0xf] %vm807_vm2, %v881_v21 }
 0x1d8   : > { %894 = vrot.lane.b32.xlu1 %v1121_v24, %s1231_s14 }
 0x1e9   : > { %892 = vrot.lane.b32.xlu0 %v1120_v25, %s1231_s14 }
 0x1ed   : > { %896 = vrot.lane.b32.xlu0 %v1122_v28, %s1231_s14 }
 0x1f1   : > { %900 = vrot.lane.b32.xlu0 %v1124_v29, %s1231_s14 }
 0x1f4   : > { %v511_v27 = vpop.xlane.xlu1 %510 }
 0x1f5   : > { %v544_v30 = vmul.f32 0.03125, %v511_v27 }
 0x1f7   : > { %v1505_v50 = vsub.f32 %v1330_v40, %v544_v30 }
 0x1f8   : > { %v535_v33 = vpop.xlane.xlu1 %534 }
 0x1f9   : > { %v552_v34 = vmul.f32 0.03125, %v535_v33  ;;  %v576_v16 = vmul.f32 %v1505_v50, %v1505_v50 }
 0x1fb   : > { %v1510_v37 = vsub.f32 %v1334_v44, %v552_v34  ;;  %v606_v36 = vsel %vm487_vm1, %v576_v16, 0.0 }
 0x1fc   : > { %v505_v39 = vpop.xlane.xlu1 %504  ;;  %607 = vadd.xlane.f32.xlu1 %v606_v36 }
 0x1fd   : > { %v542_v32 = vmul.f32 0.03125, %v505_v39  ;;  %v584_v41 = vmul.f32 %v1510_v37, %v1510_v37 }
 0x1ff   : > { %v1516_v40 = vsub.f32 %v1332_v43, %v542_v32  ;;  %v630_v42 = vsel %vm487_vm1, %v584_v41, 0.0 }
 0x200   : > { %v529_v47 = vpop.xlane.xlu1 %528  ;;  %631 = vadd.xlane.f32.xlu1 %v630_v42 }
 0x201   : > { %v550_v48 = vmul.f32 0.03125, %v529_v47  ;;  %v574_v51 = vmul.f32 %v1516_v40, %v1516_v40 }
 0x203   : > { %v1522_v53 = vsub.f32 %v1336_v45, %v550_v48  ;;  %v600_v49 = vsel %vm487_vm1, %v574_v51, 0.0 }
 0x204   : > { %v887_v54 = vpop.permute.xlu1 %886  ;;  %601 = vadd.xlane.f32.xlu1 %v600_v49 }
 0x205   : > { %927 = vst.msk [vmem:[%s1396_s17 + $0x1c] sm:$0xf] %vm807_vm2, %v887_v54  ;;  %v582_v43 = vmul.f32 %v1522_v53, %v1522_v53 }
 0x207   : > { %v624_v55 = vsel %vm487_vm1, %v582_v43, 0.0 }
 0x208   : > { %v883_v56 = vpop.permute.xlu1 %882  ;;  %625 = vadd.xlane.f32.xlu1 %v624_v55 }
 0x209   : > { %925 = vst.msk [vmem:[%s1396_s17 + $0x14] sm:$0xf] %vm807_vm2, %v883_v56 }
 0x20f   : > { %v593_v59 = vpop.xlane.xlu0 %592 }
 0x210   : > { %v635_v60 = vmul.f32 0.03125, %v593_v59 }
 0x212   : > { %v651_v61 = vadd.f32 1e-05, %v635_v60 }
 0x213   : > { %v617_v62 = vpop.xlane.xlu0 %616 }
 0x214   : > { %1191 = vrsqrt.f32 %v651_v61  ;;  %v643_v0 = vmul.f32 0.03125, %v617_v62 }
 0x216   : > { %v659_v52 = vadd.f32 1e-05, %v643_v0 }
 0x217   : > { %v587_v1 = vpop.xlane.xlu0 %586 }
 0x218   : > { %1193 = vrsqrt.f32 %v659_v52  ;;  %v633_v2 = vmul.f32 0.03125, %v587_v1 }
 0x219   : > { %898 = vrot.lane.b32.xlu1 %v1123_v26, %s1231_s14 }
 0x21a   : > { %v649_v3 = vadd.f32 1e-05, %v633_v2 }
 0x21b   : > { %v611_v31 = vpop.xlane.xlu0 %610 }
 0x21c   : > { %1195 = vrsqrt.f32 %v649_v3  ;;  %v641_v6 = vmul.f32 0.03125, %v611_v31 }
 0x21d   : > { %902 = vrot.lane.b32.xlu1 %v1125_v5, %s1231_s14 }
 0x21e   : > { %v1192_v7 = vpop.eup %1191  ;;  %v657_v45 = vadd.f32 1e-05, %v641_v6 }
 0x21f   : > { %v683_v12 = vmul.f32 %v1192_v7, %v1402_v10 }
 0x220   : > { %1197 = vrsqrt.f32 %v657_v45 }
 0x221   : > { %v706_v44 = vmul.f32 %v1541_v8, %v683_v12 }
 0x222   : > { %v1194_v14 = vpop.eup %1193 }
 0x223   : > { %v729_v18 = vadd.f32 %v1547_v13, %v706_v44  ;;  %v691_v15 = vmul.f32 %v1194_v14, %v1399_v9 }
 0x225   : > { %v1096_v10 = vpack.c.bf16 %v729_v18, %v729_v18  ;;  %v714_v20 = vmul.f32 %v1541_v8, %v691_v15 }
 0x226   : > { %v1196_v22 = vpop.eup %1195 }
 0x227   : > { %810 = vst.msk [vmem:[%s1556_s25 + $0x8] sm:$0xf] %vm807_vm2, %v1096_v10  ;;  %v737_v35 = vadd.f32 %v1547_v13, %v714_v20  ;;  %v681_v21 = vmul.f32 %v1196_v22, %v1409_v17 }
 0x229   : > { %v1104_v9 = vpack.c.bf16 %v737_v35, %v737_v35  ;;  %v704_v24 = vmul.f32 %v1541_v8, %v681_v21 }
 0x22a   : > { %v1198_v25 = vpop.eup %1197 }
 0x22b   : > { %818 = vst.msk [vmem:[%s1556_s25 + $0x28] sm:$0xf] %vm807_vm2, %v1104_v9  ;;  %v727_v28 = vadd.f32 %v1547_v13, %v704_v24  ;;  %v689_v29 = vmul.f32 %v1198_v25, %v1418_v23 }
 0x22d   : > { %v1094_v27 = vpack.c.bf16 %v727_v28, %v727_v28  ;;  %v712_v30 = vmul.f32 %v1541_v8, %v689_v29 }
 0x22f   : > { %808 = vst.msk [vmem:[%s1556_s25] sm:$0xf] %vm807_vm2, %v1094_v27  ;;  %v735_v33 = vadd.f32 %v1547_v13, %v712_v30 }
 0x231   : > { %v1102_v34 = vpack.c.bf16 %v735_v33, %v735_v33 }
 0x233   : > { %816 = vst.msk [vmem:[%s1556_s25 + $0x20] sm:$0xf] %vm807_vm2, %v1102_v34 }
 0x244   : > { %v596_v17 = vpop.xlane.xlu1 %595 }
 0x245   : > { %v636_v16 = vmul.f32 0.03125, %v596_v17 }
 0x247   : > { %v652_v36 = vadd.f32 1e-05, %v636_v16 }
 0x248   : > { %v620_v39 = vpop.xlane.xlu1 %619 }
 0x249   : > { %1199 = vrsqrt.f32 %v652_v36  ;;  %v644_v32 = vmul.f32 0.03125, %v620_v39 }
 0x24b   : > { %v660_v41 = vadd.f32 1e-05, %v644_v32 }
 0x24d   : > { %1201 = vrsqrt.f32 %v660_v41 }
 0x250   : > { %v590_v42 = vpop.xlane.xlu1 %589 }
 0x251   : > { %v634_v23 = vmul.f32 0.03125, %v590_v42 }
 0x253   : > { %v1200_v47 = vpop.eup %1199  ;;  %v650_v48 = vadd.f32 1e-05, %v634_v23 }
 0x254   : > { %v684_v51 = vmul.f32 %v1200_v47, %v1435_v38  ;;  %v614_v49 = vpop.xlane.xlu1 %613  ;;  %v605_v54 = vpop.xlane.xlu0 %604 }
 0x255   : > { %1203 = vrsqrt.f32 %v650_v48  ;;  %v642_v43 = vmul.f32 0.03125, %v614_v49  ;;  %v639_v55 = vmul.f32 0.03125, %v605_v54 }
 0x256   : > { %v707_v56 = vmul.f32 %v1541_v8, %v684_v51 }
 0x257   : > { %v1202_v59 = vpop.eup %1201  ;;  %v658_v60 = vadd.f32 1e-05, %v642_v43  ;;  %v655_v61 = vadd.f32 1e-05, %v639_v55 }
 0x258   : > { %v730_v62 = vadd.f32 %v1547_v13, %v707_v56  ;;  %v692_v0 = vmul.f32 %v1202_v59, %v1440_v46  ;;  %v895_v52 = vpop.permute.xlu1 %894  ;;  %v629_v1 = vpop.xlane.xlu0 %628 }
 0x259   : > { %1205 = vrsqrt.f32 %v658_v60  ;;  %931 = vst.msk [vmem:[%s1396_s17 + $0x2c] sm:$0xf] %vm807_vm2, %v895_v52  ;;  %v647_v38 = vmul.f32 0.03125, %v629_v1 }
 0x25a   : > { %v1097_v26 = vpack.c.bf16 %v730_v62, %v730_v62  ;;  %v715_v2 = vmul.f32 %v1541_v8, %v692_v0  ;;  %1207 = vrsqrt.f32 %v655_v61 }
 0x25b   : > { %v663_v3 = vadd.f32 1e-05, %v647_v38 }
 0x25c   : > { %811 = vst.msk [vmem:[%s1556_s25 + $0xc] sm:$0xf] %vm807_vm2, %v1097_v26  ;;  %v738_v31 = vadd.f32 %v1547_v13, %v715_v2  ;;  %v599_v5 = vpop.xlane.xlu0 %598 }
 0x25d   : > { %1209 = vrsqrt.f32 %v663_v3  ;;  %v637_v6 = vmul.f32 0.03125, %v599_v5 }
 0x25e   : > { %v1105_v46 = vpack.c.bf16 %v738_v31, %v738_v31 }
 0x25f   : > { %v1204_v7 = vpop.eup %1203  ;;  %v653_v45 = vadd.f32 1e-05, %v637_v6 }
 0x260   : > { %819 = vst.msk [vmem:[%s1556_s25 + $0x2c] sm:$0xf] %vm807_vm2, %v1105_v46  ;;  %v682_v12 = vmul.f32 %v1204_v7, %v1452_v58  ;;  %v623_v44 = vpop.xlane.xlu0 %622 }
 0x261   : > { %1211 = vrsqrt.f32 %v653_v45  ;;  %v645_v14 = vmul.f32 0.03125, %v623_v44 }
 0x262   : > { %v705_v18 = vmul.f32 %v1541_v8, %v682_v12 }
 0x263   : > { %v1206_v15 = vpop.eup %1205  ;;  %v661_v10 = vadd.f32 1e-05, %v645_v14 }
 0x264   : > { %v1208_v20 = vpop.eup %1207  ;;  %v728_v22 = vadd.f32 %v1547_v13, %v705_v18  ;;  %v690_v35 = vmul.f32 %v1206_v15, %v1449_v57  ;;  %v893_v21 = vpop.permute.xlu0 %892 }
 0x265   : > { %v687_v9 = vmul.f32 %v1208_v20, %v1459_v63  ;;  %1213 = vrsqrt.f32 %v661_v10  ;;  %930 = vst.msk [vmem:[%s1396_s17 + $0x28] sm:$0xf] %vm807_vm2, %v893_v21 }
 0x266   : > { %v1095_v58 = vpack.c.bf16 %v728_v22, %v728_v22  ;;  %v713_v24 = vmul.f32 %v1541_v8, %v690_v35 }
 0x267   : > { %v1210_v25 = vpop.eup %1209  ;;  %v710_v28 = vmul.f32 %v1541_v8, %v687_v9 }
 0x268   : > { %809 = vst.msk [vmem:[%s1556_s25 + $0x4] sm:$0xf] %vm807_vm2, %v1095_v58  ;;  %v736_v29 = vadd.f32 %v1547_v13, %v713_v24  ;;  %v695_v57 = vmul.f32 %v1210_v25, %v1469_v4  ;;  %v897_v27 = vpop.permute.xlu0 %896 }
 0x269   : > { %v733_v63 = vadd.f32 %v1547_v13, %v710_v28  ;;  %932 = vst.msk [vmem:[%s1396_s17 + $0x30] sm:$0xf] %vm807_vm2, %v897_v27 }
 0x26a   : > { %v1103_v30 = vpack.c.bf16 %v736_v29, %v736_v29  ;;  %v718_v33 = vmul.f32 %v1541_v8, %v695_v57 }
 0x26b   : > { %v1212_v34 = vpop.eup %1211  ;;  %v1100_v17 = vpack.c.bf16 %v733_v63, %v733_v63 }
 0x26c   : > { %817 = vst.msk [vmem:[%s1556_s25 + $0x24] sm:$0xf] %vm807_vm2, %v1103_v30  ;;  %v741_v16 = vadd.f32 %v1547_v13, %v718_v33  ;;  %v685_v36 = vmul.f32 %v1212_v34, %v1476_v11  ;;  %v901_v4 = vpop.permute.xlu0 %900 }
 0x26d   : > { %814 = vst.msk [vmem:[%s1556_s25 + $0x18] sm:$0xf] %vm807_vm2, %v1100_v17  ;;  %934 = vst.msk [vmem:[%s1396_s17 + $0x38] sm:$0xf] %vm807_vm2, %v901_v4 }
 0x26e   : > { %v1108_v39 = vpack.c.bf16 %v741_v16, %v741_v16  ;;  %v708_v32 = vmul.f32 %v1541_v8, %v685_v36 }
 0x26f   : > { %v1214_v41 = vpop.eup %1213 }
 0x270   : > { %822 = vst.msk [vmem:[%s1556_s25 + $0x38] sm:$0xf] %vm807_vm2, %v1108_v39  ;;  %v731_v42 = vadd.f32 %v1547_v13, %v708_v32  ;;  %v693_v23 = vmul.f32 %v1214_v41, %v1482_v19 }
 0x272   : > { %v1098_v47 = vpack.c.bf16 %v731_v42, %v731_v42  ;;  %v716_v48 = vmul.f32 %v1541_v8, %v693_v23 }
 0x274   : > { %812 = vst.msk [vmem:[%s1556_s25 + $0x10] sm:$0xf] %vm807_vm2, %v1098_v47  ;;  %v739_v11 = vadd.f32 %v1547_v13, %v716_v48 }
 0x276   : > { %v1106_v51 = vpack.c.bf16 %v739_v11, %v739_v11 }
 0x278   : > { %820 = vst.msk [vmem:[%s1556_s25 + $0x30] sm:$0xf] %vm807_vm2, %v1106_v51 }
 0x289   : > { %v608_v49 = vpop.xlane.xlu1 %607 }
 0x28a   : > { %v640_v54 = vmul.f32 0.03125, %v608_v49 }
 0x28c   : > { %v656_v43 = vadd.f32 1e-05, %v640_v54 }
 0x28d   : > { %v632_v55 = vpop.xlane.xlu1 %631 }
 0x28e   : > { %1215 = vrsqrt.f32 %v656_v43  ;;  %v648_v56 = vmul.f32 0.03125, %v632_v55 }
 0x290   : > { %v664_v59 = vadd.f32 1e-05, %v648_v56 }
 0x291   : > { %v602_v60 = vpop.xlane.xlu1 %601 }
 0x292   : > { %1217 = vrsqrt.f32 %v664_v59  ;;  %v638_v19 = vmul.f32 0.03125, %v602_v60 }
 0x294   : > { %v654_v61 = vadd.f32 1e-05, %v638_v19 }
 0x295   : > { %v626_v62 = vpop.xlane.xlu1 %625 }
 0x296   : > { %1219 = vrsqrt.f32 %v654_v61  ;;  %v646_v0 = vmul.f32 0.03125, %v626_v62 }
 0x298   : > { %v1216_v52 = vpop.eup %1215  ;;  %v662_v1 = vadd.f32 1e-05, %v646_v0 }
 0x299   : > { %v688_v38 = vmul.f32 %v1216_v52, %v1505_v50  ;;  %v899_v26 = vpop.permute.xlu1 %898 }
 0x29a   : > { %1221 = vrsqrt.f32 %v662_v1  ;;  %933 = vst.msk [vmem:[%s1396_s17 + $0x34] sm:$0xf] %vm807_vm2, %v899_v26 }
 0x29b   : > { %v711_v2 = vmul.f32 %v1541_v8, %v688_v38 }
 0x29c   : > { %v1218_v3 = vpop.eup %1217 }
 0x29d   : > { %v734_v31 = vadd.f32 %v1547_v13, %v711_v2  ;;  %v696_v5 = vmul.f32 %v1218_v3, %v1510_v37  ;;  %v903_v6 = vpop.permute.xlu1 %902 }
 0x29e   : > { %935 = vst.msk [vmem:[%s1396_s17 + $0x3c] sm:$0xf] %vm807_vm2, %v903_v6 }
 0x29f   : > { %v1101_v46 = vpack.c.bf16 %v734_v31, %v734_v31  ;;  %v719_v7 = vmul.f32 %v1541_v8, %v696_v5 }
 0x2a0   : > { %v1220_v50 = vpop.eup %1219 }
 0x2a1   : > { %815 = vst.msk [vmem:[%s1556_s25 + $0x1c] sm:$0xf] %vm807_vm2, %v1101_v46  ;;  %v742_v45 = vadd.f32 %v1547_v13, %v719_v7  ;;  %v686_v12 = vmul.f32 %v1220_v50, %v1516_v40 }
 0x2a3   : > { %v1109_v44 = vpack.c.bf16 %v742_v45, %v742_v45  ;;  %v709_v14 = vmul.f32 %v1541_v8, %v686_v12 }
 0x2a4   : > { %v1222_v18 = vpop.eup %1221 }
 0x2a5   : > { %823 = vst.msk [vmem:[%s1556_s25 + $0x3c] sm:$0xf] %vm807_vm2, %v1109_v44  ;;  %v732_v37 = vadd.f32 %v1547_v13, %v709_v14  ;;  %v694_v15 = vmul.f32 %v1222_v18, %v1522_v53 }
 0x2a7   : > { %v1099_v10 = vpack.c.bf16 %v732_v37, %v732_v37  ;;  %v717_v20 = vmul.f32 %v1541_v8, %v694_v15 }
 0x2a9   : > { %813 = vst.msk [vmem:[%s1556_s25 + $0x14] sm:$0xf] %vm807_vm2, %v1099_v10  ;;  %v740_v22 = vadd.f32 %v1547_v13, %v717_v20 }
 0x2ab   : > { %v1107_v35 = vpack.c.bf16 %v740_v22, %v740_v22 }
 0x2ad   : > { %821 = vst.msk [vmem:[%s1556_s25 + $0x34] sm:$0xf] %vm807_vm2, %v1107_v35 }
 0x2ae PF: > { %s17_s21 = sadd.s32 1, %s1229_s21  }
 0x2af   : > { %p14_p4 = scmp.ge.s32.totalorder %s17_s21, 4  }
 0x2b1   :  { %16 = sbr.rel (!%p14_p4) target bundleno = 1 (0x1), region = 82 }

</bundles_post_ra>
